<compile_context>
chip_gen: v5e
topology: v5e:2x2
jax: 0.10.0
libtpu: 0.0.40
codegen_flags: <defaults>
</compile_context>

<pallas_src>
import functools

import jax
import jax.numpy as jnp
from jax.experimental import pallas as pl
from jax.experimental.pallas import tpu as pltpu


def _round_up(n, m):
    return ((n + m - 1) // m) * m


def vanet_kernel(x_ref, w1_ref, b1_ref, wh_ref, bh_ref, q_ref, *, action_dim):
    # x_ref:  (TB, S)   f32
    # w1_ref: (S, Hp)   bf16 (or f32)      b1_ref: (1, Hp) f32
    # wh_ref: (Hp, Np)  bf16 (or f32)      bh_ref: (1, Np) f32
    #   fused head: cols [0, A) = A head, col A = V head, cols > A are zero.
    # q_ref:  (TB, action_dim) f32  -- narrow, only the real Q lanes are stored.
    compute_dtype = w1_ref.dtype
    x = x_ref[...].astype(compute_dtype)

    # Shared trunk: fc1 + ReLU (PyTorch computes it twice; result identical).
    h = jnp.dot(x, w1_ref[...], preferred_element_type=jnp.float32) + b1_ref[...]
    h = jnp.maximum(h, 0.0)                                           # (TB, Hp) f32

    # Fused A/V heads: one MXU pass, f32 accumulation.
    out = (jnp.dot(h.astype(compute_dtype), wh_ref[...],
                   preferred_element_type=jnp.float32) + bh_ref[...])  # (TB, Np) f32

    # Single fused reduction:  c = v_mask - a_mask / action_dim   (static constant)
    # corr = sum(out * c, axis=-1) = V - mean(A)
    np_cols = out.shape[1]
    col = jax.lax.broadcasted_iota(jnp.int32, (1, np_cols), 1)
    inv_a = jnp.float32(1.0 / float(action_dim))
    c = jnp.where(col == action_dim, jnp.float32(1.0),
                  jnp.where(col < action_dim, -inv_a, jnp.float32(0.0)))
    corr = jnp.sum(out * c, axis=1, keepdims=True)                    # (TB, 1)

    # Q = A + (V - mean(A)); store only the real action lanes.
    q_ref[...] = (out[:, :action_dim] + corr).astype(q_ref.dtype)


def prepare_vanet_params(w1, b1, wa, ba, wv, bv, *, use_bf16=True):
    """One-time layout prep (hoisted out of the per-call hot path).

    Inputs are in PyTorch Linear layout: weights (out, in), biases (out,).
    Returns pre-transposed, zero-padded, lane-dense tensors for the kernel.
    Weights are cast to bf16 (MXU-native) unless use_bf16=False; biases stay f32.
    """
    hidden_dim, state_dim = w1.shape
    action_dim = wa.shape[0]

    hp = _round_up(hidden_dim, 128)           # lane-dense hidden
    np_cols = _round_up(action_dim + 1, 128)  # lane-dense fused head output
    w_dtype = jnp.bfloat16 if use_bf16 else jnp.float32

    # fc1: (S, Hp)
    w1_p = (jnp.zeros((state_dim, hp), jnp.float32)
            .at[:, :hidden_dim].set(w1.T).astype(w_dtype))
    b1_p = jnp.zeros((1, hp), jnp.float32).at[0, :hidden_dim].set(b1)

    # fused head: cols [0, A) = A head, col A = V head, rest zero.
    wh = jnp.concatenate([wa.T, wv.T], axis=1)                    # (H, A+1)
    bh = jnp.concatenate([ba, bv], axis=0)                        # (A+1,)
    wh_p = (jnp.zeros((hp, np_cols), jnp.float32)
            .at[:hidden_dim, :action_dim + 1].set(wh).astype(w_dtype))
    bh_p = jnp.zeros((1, np_cols), jnp.float32).at[0, :action_dim + 1].set(bh)

    return dict(
        w1=w1_p, b1=b1_p, wh=wh_p, bh=bh_p,
        state_dim=state_dim, action_dim=action_dim,
        hidden_pad=hp, out_pad=np_cols,
    )


def _choose_batch_tile(B, batch_tile):
    """Sublane-aligned batch tile, >= 2 grid steps when B > 8 (v7x megacore)."""
    if B <= 8:
        return B                                   # one block == full batch dim
    half = _round_up((B + 1) // 2, 8)              # ensures grid >= 2
    return min(batch_tile, half)


def vanet_forward(x, params, *, batch_tile=2048):
    """x: (B, state_dim) float32. params: output of prepare_vanet_params."""
    B, S = x.shape
    assert S == params["state_dim"]
    action_dim = params["action_dim"]
    hp = params["hidden_pad"]
    np_cols = params["out_pad"]

    tb = _choose_batch_tile(B, batch_tile)
    grid = (pl.cdiv(B, tb),)                       # ragged last block handled by Pallas

    kernel = functools.partial(vanet_kernel, action_dim=action_dim)

    weight_bytes = sum(int(params[k].size) * params[k].dtype.itemsize
                       for k in ("w1", "b1", "wh", "bh"))
    cost = pl.CostEstimate(
        flops=2 * B * (S * hp + hp * np_cols),
        transcendentals=0,
        bytes_accessed=int(x.size) * x.dtype.itemsize
        + B * action_dim * 4 + weight_bytes,
    )

    # Per-step VMEM: double-buffered x + q tiles, plus resident weights.
    step_bytes = 2 * tb * (S * x.dtype.itemsize + action_dim * 4)
    vmem_estimate = 2 * weight_bytes + step_bytes + (1 << 20)
    vmem_limit = min(vmem_estimate, 64 << 20) if vmem_estimate > (16 << 20) else None

    q = pl.pallas_call(
        kernel,
        out_shape=jax.ShapeDtypeStruct((B, action_dim), jnp.float32),
        grid=grid,
        in_specs=[
            pl.BlockSpec((tb, S), lambda i: (i, 0)),                # x: tiled over batch
            pl.BlockSpec(params["w1"].shape, lambda i: (0, 0)),     # weights: VMEM-resident
            pl.BlockSpec(params["b1"].shape, lambda i: (0, 0)),
            pl.BlockSpec(params["wh"].shape, lambda i: (0, 0)),
            pl.BlockSpec(params["bh"].shape, lambda i: (0, 0)),
        ],
        out_specs=pl.BlockSpec((tb, action_dim), lambda i: (i, 0)), # narrow writeback
        compiler_params=pltpu.CompilerParams(
            dimension_semantics=("parallel",),
            vmem_limit_bytes=vmem_limit,
        ),
        cost_estimate=cost,
    )(x, params["w1"], params["b1"], params["wh"], params["bh"])

    return q


def vanet_reference(x, w1, b1, wa, ba, wv, bv):
    h = jnp.maximum(x @ w1.T + b1, 0.0)
    a = h @ wa.T + ba
    v = h @ wv.T + bv
    return v + a - jnp.mean(a, axis=1, keepdims=True)


if __name__ == "__main__":
    # Small shapes consistent with the module's forward: x is (batch, state_dim).
    state_dim, hidden_dim, action_dim = 16, 32, 4

    key = jax.random.PRNGKey(0)
    ks = jax.random.split(key, 8)

    # Deterministic synthetic parameters (PyTorch Linear shapes: (out, in) / (out,)).
    w1 = jax.random.normal(ks[1], (hidden_dim, state_dim), dtype=jnp.float32) * 0.1
    b1 = jax.random.normal(ks[2], (hidden_dim,), dtype=jnp.float32) * 0.1
    wa = jax.random.normal(ks[3], (action_dim, hidden_dim), dtype=jnp.float32) * 0.1
    ba = jax.random.normal(ks[4], (action_dim,), dtype=jnp.float32) * 0.1
    wv = jax.random.normal(ks[5], (1, hidden_dim), dtype=jnp.float32) * 0.1
    bv = jax.random.normal(ks[6], (1,), dtype=jnp.float32) * 0.1

    # One-time parameter layout prep (hoisted out of the per-call path).
    params_bf16 = jax.tree_util.tree_map(
        jax.block_until_ready, prepare_vanet_params(w1, b1, wa, ba, wv, bv, use_bf16=True))
    params_f32 = jax.tree_util.tree_map(
        jax.block_until_ready, prepare_vanet_params(w1, b1, wa, ba, wv, bv, use_bf16=False))

    # Case 1: small batch, single grid step.
    B1 = 8
    x1 = jax.random.normal(ks[0], (B1, state_dim), dtype=jnp.float32)
    q1 = jax.block_until_ready(vanet_forward(x1, params_bf16))
    q1_f32 = jax.block_until_ready(vanet_forward(x1, params_f32))
    q1_ref = vanet_reference(x1, w1, b1, wa, ba, wv, bv)
    assert q1.shape == (B1, action_dim)
    assert jnp.allclose(q1_f32, q1_ref, atol=1e-5, rtol=1e-5), "f32 mismatch vs reference"
    assert jnp.allclose(q1, q1_ref, atol=3e-2, rtol=3e-2), "bf16 mismatch vs reference"

    # Case 2: larger batch -> multi-step parallel grid.
    B2 = 32
    x2 = jax.random.normal(ks[7], (B2, state_dim), dtype=jnp.float32)
    q2 = jax.block_until_ready(vanet_forward(x2, params_bf16))
    q2_ref = vanet_reference(x2, w1, b1, wa, ba, wv, bv)
    assert q2.shape == (B2, action_dim)
    assert jnp.allclose(q2, q2_ref, atol=3e-2, rtol=3e-2), "bf16 mismatch vs reference (B=32)"

    print("KERNEL_OK")
</pallas_src>

<mosaic_0001>
module attributes {stable_mosaic.version = 11 : i64} {
  func.func @vanet_kernel(%arg0: i32, %arg1: memref<8x16xf32, #tpu.memory_space<vmem>>, %arg2: memref<16x128xbf16, #tpu.memory_space<vmem>>, %arg3: memref<1x128xf32, #tpu.memory_space<vmem>>, %arg4: memref<128x128xbf16, #tpu.memory_space<vmem>>, %arg5: memref<1x128xf32, #tpu.memory_space<vmem>>, %arg6: memref<8x4xf32, #tpu.memory_space<vmem>>) attributes {dimension_semantics = [#tpu.dimension_semantics<parallel>], iteration_bounds = array<i64: 1>, scalar_prefetch = 0 : i64, scratch_operands = 0 : i64, tpu.core_type = #tpu.core_type<tc>, window_params = [{transform_indices = @transform_0, window_bounds = array<i64: 8, 16>}, {pipeline_mode = #tpu.pipeline_mode<synchronous>, transform_indices = @transform_1, window_bounds = array<i64: 16, 128>}, {pipeline_mode = #tpu.pipeline_mode<synchronous>, transform_indices = @transform_2, window_bounds = array<i64: 1, 128>}, {pipeline_mode = #tpu.pipeline_mode<synchronous>, transform_indices = @transform_3, window_bounds = array<i64: 128, 128>}, {pipeline_mode = #tpu.pipeline_mode<synchronous>, transform_indices = @transform_4, window_bounds = array<i64: 1, 128>}, {transform_indices = @transform_5, window_bounds = array<i64: 8, 4>}]} {
    %c0 = arith.constant 0 : index
    %c0_0 = arith.constant 0 : index
    %0 = vector.load %arg1[%c0, %c0_0] : memref<8x16xf32, #tpu.memory_space<vmem>>, vector<8x16xf32>
    %1 = arith.truncf %0 : vector<8x16xf32> to vector<8x16xbf16>
    %c0_1 = arith.constant 0 : index
    %c0_2 = arith.constant 0 : index
    %2 = vector.load %arg2[%c0_1, %c0_2] : memref<16x128xbf16, #tpu.memory_space<vmem>>, vector<16x128xbf16>
    %cst = arith.constant dense<0.000000e+00> : vector<8x128xf32>
    %3 = tpu.matmul %1, %2, %cst {dimension_numbers = #tpu.dot_dimension_numbers<[1], [0], [0], [1], [0, 0, 1, 1], [], []>} : vector<8x16xbf16>, vector<16x128xbf16>, vector<8x128xf32> -> vector<8x128xf32>
    %c0_3 = arith.constant 0 : index
    %c0_4 = arith.constant 0 : index
    %4 = vector.load %arg3[%c0_3, %c0_4] : memref<1x128xf32, #tpu.memory_space<vmem>>, vector<1x128xf32>
    %5 = vector.broadcast %4 : vector<1x128xf32> to vector<8x128xf32>
    %6 = arith.addf %3, %5 : vector<8x128xf32>
    %cst_5 = arith.constant 0.000000e+00 : f32
    %7 = vector.broadcast %cst_5 : f32 to vector<8x128xf32>
    %8 = arith.maximumf %6, %7 : vector<8x128xf32>
    %9 = arith.truncf %8 : vector<8x128xf32> to vector<8x128xbf16>
    %c0_6 = arith.constant 0 : index
    %c0_7 = arith.constant 0 : index
    %10 = vector.load %arg4[%c0_6, %c0_7] : memref<128x128xbf16, #tpu.memory_space<vmem>>, vector<128x128xbf16>
    %cst_8 = arith.constant dense<0.000000e+00> : vector<8x128xf32>
    %11 = tpu.matmul %9, %10, %cst_8 {dimension_numbers = #tpu.dot_dimension_numbers<[1], [0], [0], [1], [0, 0, 1, 1], [], []>} : vector<8x128xbf16>, vector<128x128xbf16>, vector<8x128xf32> -> vector<8x128xf32>
    %c0_9 = arith.constant 0 : index
    %c0_10 = arith.constant 0 : index
    %12 = vector.load %arg5[%c0_9, %c0_10] : memref<1x128xf32, #tpu.memory_space<vmem>>, vector<1x128xf32>
    %13 = vector.broadcast %12 : vector<1x128xf32> to vector<8x128xf32>
    %14 = arith.addf %11, %13 : vector<8x128xf32>
    %15 = tpu.iota {dimensions = array<i32: 1>} : vector<1x128xi32>
    %c4_i32 = arith.constant 4 : i32
    %16 = vector.broadcast %c4_i32 : i32 to vector<1x128xi32>
    %17 = arith.cmpi eq, %15, %16 : vector<1x128xi32>
    %c4_i32_11 = arith.constant 4 : i32
    %18 = vector.broadcast %c4_i32_11 : i32 to vector<1x128xi32>
    %19 = arith.cmpi slt, %15, %18 : vector<1x128xi32>
    %cst_12 = arith.constant 0.000000e+00 : f32
    %cst_13 = arith.constant 2.500000e-01 : f32
    %20 = arith.subf %cst_12, %cst_13 : f32
    %cst_14 = arith.constant 0.000000e+00 : f32
    %21 = vector.broadcast %20 : f32 to vector<1x128xf32>
    %22 = vector.broadcast %cst_14 : f32 to vector<1x128xf32>
    %23 = arith.select %19, %21, %22 : vector<1x128xi1>, vector<1x128xf32>
    %cst_15 = arith.constant 1.000000e+00 : f32
    %24 = vector.broadcast %cst_15 : f32 to vector<1x128xf32>
    %25 = arith.select %17, %24, %23 : vector<1x128xi1>, vector<1x128xf32>
    %26 = vector.broadcast %25 : vector<1x128xf32> to vector<8x128xf32>
    %27 = arith.mulf %14, %26 : vector<8x128xf32>
    %cst_16 = arith.constant dense<0.000000e+00> : vector<8xf32>
    %28 = vector.multi_reduction <add>, %27, %cst_16 [1] : vector<8x128xf32> to vector<8xf32>
    %29 = vector.shape_cast %28 : vector<8xf32> to vector<8x1xf32>
    %30 = vector.extract_strided_slice %14 {offsets = [0, 0], sizes = [8, 4], strides = [1, 1]} : vector<8x128xf32> to vector<8x4xf32>
    %31 = vector.broadcast %29 : vector<8x1xf32> to vector<8x4xf32>
    %32 = arith.addf %30, %31 : vector<8x4xf32>
    %c0_17 = arith.constant 0 : index
    %c0_18 = arith.constant 0 : index
    %33 = vector.load %arg6[%c0_17, %c0_18] : memref<8x4xf32, #tpu.memory_space<vmem>>, vector<8x4xf32>
    tpu.vector_store %arg6[%c0_17, %c0_18], %32 {strides = array<i32>} : memref<8x4xf32, #tpu.memory_space<vmem>>, vector<8x4xf32>,
    return
  }
  func.func @transform_0(%arg0: i32) -> (i32, i32) {
    %c0_i32 = arith.constant 0 : i32
    %c0_i32_0 = arith.constant 0 : i32
    return %arg0, %c0_i32 : i32, i32
  }
  func.func @transform_1(%arg0: i32) -> (i32, i32) {
    %c0_i32 = arith.constant 0 : i32
    %c0_i32_0 = arith.constant 0 : i32
    %c0_i32_1 = arith.constant 0 : i32
    return %c0_i32, %c0_i32_0 : i32, i32
  }
  func.func @transform_2(%arg0: i32) -> (i32, i32) {
    %c0_i32 = arith.constant 0 : i32
    %c0_i32_0 = arith.constant 0 : i32
    %c0_i32_1 = arith.constant 0 : i32
    return %c0_i32, %c0_i32_0 : i32, i32
  }
  func.func @transform_3(%arg0: i32) -> (i32, i32) {
    %c0_i32 = arith.constant 0 : i32
    %c0_i32_0 = arith.constant 0 : i32
    %c0_i32_1 = arith.constant 0 : i32
    return %c0_i32, %c0_i32_0 : i32, i32
  }
  func.func @transform_4(%arg0: i32) -> (i32, i32) {
    %c0_i32 = arith.constant 0 : i32
    %c0_i32_0 = arith.constant 0 : i32
    %c0_i32_1 = arith.constant 0 : i32
    return %c0_i32, %c0_i32_0 : i32, i32
  }
  func.func @transform_5(%arg0: i32) -> (i32, i32) {
    %c0_i32 = arith.constant 0 : i32
    %c0_i32_0 = arith.constant 0 : i32
    return %arg0, %c0_i32 : i32, i32
  }
}

</mosaic_0001>

<bundles_post_ra>
// kernel: tpu_custom_call.1
= control target key start
LH: loop header
LB: loop body
LE: loop exit
PB: predicated region body
PF: predicated region fallthrough
CT: control target
= control target key end

     0   :  { %10 = vsyncpa [#allocation3], 0  ;;  %s382_s0 = inlined_call_operand.hbm [shape: f32[8,16], index: 0, kind: input, shape index: {}]   ;;  %s383_s1 = inlined_call_operand.hbm [shape: bf16[16,128], index: 1, kind: input, shape index: {}]   ;;  %s384_s2 = inlined_call_operand.vmem [shape: f32[1,128], index: 2, kind: input, shape index: {}]   ;;  %s385_s3 = inlined_call_operand.hbm [shape: bf16[128,128], index: 3, kind: input, shape index: {}]   ;;  %s386_s4 = inlined_call_operand.vmem [shape: f32[1,128], index: 4, kind: input, shape index: {}]   ;;  %s387_s5 = inlined_call_operand.vmem [shape: f32[8,4], index: 5, kind: output, shape index: {}]  }
   0x1   :  { %11 = vsyncpa [#allocation5], 0  ;;  %s27_s20 = sshll.u32 %s383_s1, 4  ;;  %s328_s21 = smov [#allocation4]   ;;  %s28_s20 = int_to_ptr.hbm [resolvable:$true] %s27_s20 }
   0x2   :  { %s29_s22 = sshll.u32 %s328_s21, 4  ;;  %s17_s25 = sshll.u32 %s382_s0, 4  ;;  %s30_s22 = int_to_ptr.vmem [resolvable:$true] %s29_s22  ;;  %s18_s25 = int_to_ptr.hbm [resolvable:$true] %s17_s25 }
   0x3   :  { %s329_s26 = smov 64   ;;  %s330_s27 = smov 4  }
   0x4   :  { %35 = dma.hbm_to_vmem [thread:$0]  %s28_s20, 128, %s30_s22, [#allocation5], %s329_s26, %s329_s26, %s330_s27  }
   0x5   :  { %s331_s28 = smov [#allocation2]   ;;  %s42_s7 = sshll.u32 %s385_s3, 4  ;;  %s43_s7 = int_to_ptr.hbm [resolvable:$true] %s42_s7 }
   0x6   :  { %s19_s29 = sshll.u32 %s331_s28, 4  ;;  %s332_s1 = smov [#allocation6]   ;;  %s20_s29 = int_to_ptr.vmem [resolvable:$true] %s19_s29 }
   0x7   :  { %22 = dma.hbm_to_vmem [thread:$0]  %s18_s25, 128, %s20_s29, [#allocation3]  }
   0x8   :  { %s44_s8 = sshll.u32 %s332_s1, 4  ;;  %s45_s8 = int_to_ptr.vmem [resolvable:$true] %s44_s8 }
   0x9   :  { %50 = dma.hbm_to_vmem [thread:$0]  %s43_s7, 1024, %s45_s8, [#allocation5], %s329_s26, %s329_s26, %s330_s27  }
   0xa   :  { %324 = dma.done.wait [#allocation3], 128  }
   0xb   :  { %325 = vsyncadd [#allocation3], 4294967168 }
   0xc   :  { %326 = dma.done.wait [#allocation5], 1152  }
   0xd   :  { %327 = vsyncadd [#allocation5], 4294966144  ;;  %v235_v0 = vld [vmem:[#allocation4] sm:$0xff]  ;;  %v66_v1 = vld [vmem:[#allocation2] sm:$0xff]  ;;  %vm80_vm0 = vcmask 130048   ;;  %v180_v17 = vlaneseq  ;;  %v333_v20 = vmov 0.0  }
   0xe   :  { %v243_v2 = vld [vmem:[#allocation6 + $0x38] sm:$0xff]  ;;  %v67_v3 = vpack.c.bf16 %v66_v1, %v66_v1  ;;  %91 = vmatpush.bf16.msra.mxu0 %v235_v0  ;;  %v242_v4 = vld [vmem:[#allocation6 + $0x30] sm:$0xff]  ;;  %v241_v5 = vld [vmem:[#allocation6 + $0x28] sm:$0xff]  ;;  %vm190_vm3 = vcmask 31744  }
   0xf   :  { %167 = vmatpush.bf16.msra.mxu1 %v243_v2  ;;  %v240_v6 = vld [vmem:[#allocation6 + $0x20] sm:$0xff]  ;;  %v239_v7 = vld [vmem:[#allocation6 + $0x18] sm:$0xff]  ;;  %v238_v8 = vld [vmem:[#allocation6 + $0x10] sm:$0xff]  ;;  %v181_v18 = vand.u32 127, %v180_v17 }
  0x10   :  { %v237_v9 = vld [vmem:[#allocation6 + $0x8] sm:$0xff]  ;;  %v236_v10 = vld [vmem:[#allocation6] sm:$0xff]  ;;  %v250_v11 = vld [vmem:[%s384_s2] ss:$0 sm:$0xff] }
  0x11   :  { %202 = vmatmul.msk.bf16.vlgmr.msra.gmra.mxu0 %vm80_vm0, %v67_v3  ;;  %vm183_vm1 = vcmp.lt.s32.totalorder %v181_v18, 4  ;;  %v251_v19 = vld [vmem:[%s386_s4] ss:$0 sm:$0xff]  ;;  %vm182_vm2 = vcmp.eq.s32.totalorder %v181_v18, 4 }
  0x12   :  { %v184_v21 = vsel %vm183_vm1, -0.25, %v333_v20 }
  0x13   :  { %168 = vmatpush.bf16.msra.mxu1 %v242_v4  ;;  %v185_v23 = vsel %vm182_vm2, 1.0, %v184_v21 }
  0x17   :  { %169 = vmatpush.bf16.msra.mxu1 %v241_v5 }
  0x1b   :  { %170 = vmatpush.bf16.msra.mxu1 %v240_v6 }
  0x1f   :  { %171 = vmatpush.bf16.msra.mxu1 %v239_v7 }
  0x23   :  { %172 = vmatpush.bf16.msra.mxu1 %v238_v8 }
  0x27   :  { %173 = vmatpush.bf16.msra.mxu1 %v237_v9 }
  0x2b   :  { %174 = vmatpush.bf16.msra.mxu1 %v236_v10 }
  0x8e   :  { %v93_v12 = vpop.f32.mrf.mxu0 }
  0x8f   :  { %v94_v13 = vadd.f32 %v250_v11, %v93_v12 }
  0x91   :  { %v97_v14 = vmax.f32 %v94_v13, 0.0 }
  0x93   :  { %v98_v15 = vpack.c.bf16 %v97_v14, %v97_v14 }
  0x95   :  { %175 = vmatmul.bf16.vlgmr.msra.gmra.mxu1 %v98_v15 }
  0x96   :  { %v95_v16 = vpop.f32.mrf.mxu0 }
 0x112   :  { %v176_v22 = vpop.f32.mrf.mxu1 }
 0x113   :  { %v177_v24 = vadd.f32 %v251_v19, %v176_v22 }
 0x115   :  { %v186_v25 = vmul.f32 %v185_v23, %v177_v24 }
 0x117   :  { %187 = vadd.xlane.f32.xlu0 %v186_v25 }
 0x11a   :  { %v178_v26 = vpop.f32.mrf.mxu1 }
 0x18a   :  { %v188_v27 = vpop.xlane.xlu0 %187 }
 0x18b   :  { %v189_v28 = vadd.f32 %v188_v27, %v177_v24 }
 0x18d   :  { %191 = vst.msk [vmem:[%s387_s5] sm:$0xff] %vm190_vm3, %v189_v28 }
 0x18e   :  { %196 = vsyncpa [#allocation3], 1 }
 0x18f   :  { %197 = vsyncpa [#allocation5], 1 }

</bundles_post_ra>
